<compile_context>
chip_gen: v7x
topology: tpu7x:2x2x1
jax: 0.10.0
libtpu: 0.0.40
codegen_flags: <defaults>
</compile_context>

<pallas_src>
import functools

import jax
import jax.numpy as jnp
from jax.experimental import pallas as pl
from jax.experimental.pallas import tpu as pltpu


_INV_SQRT2 = 0.7071067811865476  # 1/sqrt(2), hoisted f32 literal


def _gelu_exact(x):
    # Matches torch.nn.functional.gelu default (erf-based, not tanh approx).
    return 0.5 * x * (1.0 + jax.lax.erf(x * _INV_SQRT2))


def _round_up(a, b):
    return (a + b - 1) // b * b


def mlp3_kernel(x_ref, w1_ref, b1_ref, w2_ref, b2_ref, w3_ref, b3_ref, o_ref):
    x = x_ref[...]
    # Layer 1: Linear(hidden -> inter0) + GELU   (dropout = identity at eval)
    h1 = jnp.dot(x, w1_ref[...], preferred_element_type=jnp.float32) + b1_ref[...]
    h1 = _gelu_exact(h1)
    # Layer 2: Linear(inter0 -> inter1) + GELU   (dropout = identity at eval)
    h2 = jnp.dot(h1, w2_ref[...], preferred_element_type=jnp.float32) + b2_ref[...]
    h2 = _gelu_exact(h2)
    # Layer 3: Linear(inter1 -> num_label_padded), no activation.
    out = jnp.dot(h2, w3_ref[...], preferred_element_type=jnp.float32) + b3_ref[...]
    o_ref[...] = out.astype(o_ref.dtype)


@functools.partial(jax.jit, static_argnames=("tm",))
def three_nonlinear_classifier(x, w1, b1, w2, b2, w3, b3, *, tm=512):
    """x: [..., hidden]; weights pre-transposed to [in, out]; returns [..., num_label]."""
    orig_shape = x.shape
    hidden = orig_shape[-1]
    x2d = x.reshape(-1, hidden)
    m = x2d.shape[0]

    inter0 = w1.shape[1]
    inter1 = w2.shape[1]
    num_label = w3.shape[1]

    # Row tile: as large as requested, but never bigger than the 8-aligned row
    # count (tiny inputs -> single grid step, minimal padding).
    tile_m = min(tm, _round_up(m, 8))
    m_pad = _round_up(m, tile_m)

    # Lane-dense output: pad N of the last layer up to a multiple of 128 so the
    # output store is an unmasked full-width vst.
    n_pad = _round_up(num_label, 128)

    x_p = jnp.pad(x2d, ((0, m_pad - m), (0, 0)))
    w3_p = jnp.pad(w3, ((0, 0), (0, n_pad - num_label)))
    b3_p = jnp.pad(b3, ((0, n_pad - num_label),))

    b1r = b1.reshape(1, inter0)
    b2r = b2.reshape(1, inter1)
    b3r = b3_p.reshape(1, n_pad)

    # Explicit VMEM budget: resident weights + double-buffered row tiles + slack,
    # clamped to 64 MiB so it is valid on v7x as well as v5e/v6e.
    elt = jnp.dtype(x.dtype).itemsize
    weight_bytes = elt * (hidden * inter0 + inter0 * inter1 + inter1 * n_pad
                          + inter0 + inter1 + n_pad)
    io_bytes = elt * tile_m * (hidden + n_pad + inter0 + inter1)  # tiles + live intermediates
    vmem_needed = 2 * (weight_bytes + io_bytes) + (2 << 20)
    vmem_limit = int(min(max(vmem_needed, 16 << 20), 64 << 20))
    # TODO(synk): for very large hidden/inter sizes exceeding VMEM (esp. v7x 64 MiB),
    # switch weights to bf16 or add a K-tiled reduction grid axis instead of full residency.

    out2d = pl.pallas_call(
        mlp3_kernel,
        out_shape=jax.ShapeDtypeStruct((m_pad, n_pad), x.dtype),
        grid_spec=pltpu.PrefetchScalarGridSpec(
            num_scalar_prefetch=0,
            grid=(m_pad // tile_m,),
            in_specs=[
                pl.BlockSpec((tile_m, hidden), lambda i: (i, 0)),    # x tile
                pl.BlockSpec((hidden, inter0), lambda i: (0, 0)),    # W1 (full, resident)
                pl.BlockSpec((1, inter0), lambda i: (0, 0)),         # b1
                pl.BlockSpec((inter0, inter1), lambda i: (0, 0)),    # W2 (full, resident)
                pl.BlockSpec((1, inter1), lambda i: (0, 0)),         # b2
                pl.BlockSpec((inter1, n_pad), lambda i: (0, 0)),     # W3 (N-padded, resident)
                pl.BlockSpec((1, n_pad), lambda i: (0, 0)),          # b3 (N-padded)
            ],
            out_specs=pl.BlockSpec((tile_m, n_pad), lambda i: (i, 0)),
        ),
        compiler_params=pltpu.CompilerParams(
            dimension_semantics=("parallel",),
            vmem_limit_bytes=vmem_limit,
        ),
    )(x_p, w1, b1r, w2, b2r, w3_p, b3r)

    out = out2d[:m, :num_label]
    return out.reshape(*orig_shape[:-1], num_label)


def init_params(key, hidden_size, inter0, inter1, num_label, dtype=jnp.float32):
    """Deterministic synthetic parameters (PyTorch-Linear-like, pre-transposed to [in, out])."""
    ks = jax.random.split(key, 6)
    w1 = jax.random.normal(ks[0], (hidden_size, inter0), dtype) * 0.02
    b1 = jax.random.normal(ks[1], (inter0,), dtype) * 0.02
    w2 = jax.random.normal(ks[2], (inter0, inter1), dtype) * 0.02
    b2 = jax.random.normal(ks[3], (inter1,), dtype) * 0.02
    w3 = jax.random.normal(ks[4], (inter1, num_label), dtype) * 0.02
    b3 = jax.random.normal(ks[5], (num_label,), dtype) * 0.02
    return w1, b1, w2, b2, w3, b3


def _reference(x, params):
    w1, b1, w2, b2, w3, b3 = params
    h1 = _gelu_exact(x @ w1 + b1)
    h2 = _gelu_exact(h1 @ w2 + b2)
    return h2 @ w3 + b3


if __name__ == "__main__":
    # Shapes consistent with the module's forward:
    # input_features: [batch=2, seq=8, hidden=32]
    hidden_size = 32
    intermediate_hidden_size_0 = 64
    intermediate_hidden_size_1 = 48
    num_label = 8
    # dropout_rate is irrelevant at inference (identity); act_func='gelu'.

    key = jax.random.PRNGKey(0)
    k_x, k_x2, k_x3, k_p = jax.random.split(key, 4)
    params = init_params(k_p, hidden_size, intermediate_hidden_size_0,
                         intermediate_hidden_size_1, num_label)

    # Main case: [2, 8, 32]
    x = jax.random.normal(k_x, (2, 8, hidden_size), jnp.float32)
    out = jax.block_until_ready(three_nonlinear_classifier(x, *params))
    ref = _reference(x, params)
    assert out.shape == (2, 8, num_label)
    assert jnp.allclose(out, ref, atol=1e-5, rtol=1e-5)

    # Uneven row count (exercises M padding, no divisibility assert): [3, 5, 32]
    x2 = jax.random.normal(k_x2, (3, 5, hidden_size), jnp.float32)
    out2 = jax.block_until_ready(three_nonlinear_classifier(x2, *params))
    ref2 = _reference(x2, params)
    assert out2.shape == (3, 5, num_label)
    assert jnp.allclose(out2, ref2, atol=1e-5, rtol=1e-5)

    # Multi-tile case (grid > 1 with tm=512): [4, 256, 32] -> 1024 rows
    x3 = jax.random.normal(k_x3, (4, 256, hidden_size), jnp.float32)
    out3 = jax.block_until_ready(three_nonlinear_classifier(x3, *params))
    ref3 = _reference(x3, params)
    assert out3.shape == (4, 256, num_label)
    assert jnp.allclose(out3, ref3, atol=1e-5, rtol=1e-5)

    print("KERNEL_OK")
</pallas_src>

<mosaic_0001>
module attributes {stable_mosaic.version = 11 : i64} {
  func.func @mlp3_kernel(%arg0: i32, %arg1: memref<16x32xf32, #tpu.memory_space<vmem>>, %arg2: memref<32x64xf32, #tpu.memory_space<vmem>>, %arg3: memref<1x64xf32, #tpu.memory_space<vmem>>, %arg4: memref<64x48xf32, #tpu.memory_space<vmem>>, %arg5: memref<1x48xf32, #tpu.memory_space<vmem>>, %arg6: memref<48x128xf32, #tpu.memory_space<vmem>>, %arg7: memref<1x128xf32, #tpu.memory_space<vmem>>, %arg8: memref<16x128xf32, #tpu.memory_space<vmem>>) attributes {dimension_semantics = [#tpu.dimension_semantics<parallel>], iteration_bounds = array<i64: 1>, scalar_prefetch = 0 : i64, scratch_operands = 0 : i64, tpu.core_type = #tpu.core_type<tc>, window_params = [{transform_indices = @transform_0, window_bounds = array<i64: 16, 32>}, {pipeline_mode = #tpu.pipeline_mode<synchronous>, transform_indices = @transform_1, window_bounds = array<i64: 32, 64>}, {pipeline_mode = #tpu.pipeline_mode<synchronous>, transform_indices = @transform_2, window_bounds = array<i64: 1, 64>}, {pipeline_mode = #tpu.pipeline_mode<synchronous>, transform_indices = @transform_3, window_bounds = array<i64: 64, 48>}, {pipeline_mode = #tpu.pipeline_mode<synchronous>, transform_indices = @transform_4, window_bounds = array<i64: 1, 48>}, {pipeline_mode = #tpu.pipeline_mode<synchronous>, transform_indices = @transform_5, window_bounds = array<i64: 48, 128>}, {pipeline_mode = #tpu.pipeline_mode<synchronous>, transform_indices = @transform_6, window_bounds = array<i64: 1, 128>}, {transform_indices = @transform_7, window_bounds = array<i64: 16, 128>}]} {
    %c0 = arith.constant 0 : index
    %c0_0 = arith.constant 0 : index
    %0 = vector.load %arg1[%c0, %c0_0] : memref<16x32xf32, #tpu.memory_space<vmem>>, vector<16x32xf32>
    %c0_1 = arith.constant 0 : index
    %c0_2 = arith.constant 0 : index
    %1 = vector.load %arg2[%c0_1, %c0_2] : memref<32x64xf32, #tpu.memory_space<vmem>>, vector<32x64xf32>
    %cst = arith.constant dense<0.000000e+00> : vector<16x64xf32>
    %2 = tpu.matmul %0, %1, %cst {dimension_numbers = #tpu.dot_dimension_numbers<[1], [0], [0], [1], [0, 0, 1, 1], [], []>} : vector<16x32xf32>, vector<32x64xf32>, vector<16x64xf32> -> vector<16x64xf32>
    %c0_3 = arith.constant 0 : index
    %c0_4 = arith.constant 0 : index
    %3 = vector.load %arg3[%c0_3, %c0_4] : memref<1x64xf32, #tpu.memory_space<vmem>>, vector<1x64xf32>
    %4 = vector.broadcast %3 : vector<1x64xf32> to vector<16x64xf32>
    %5 = arith.addf %2, %4 : vector<16x64xf32>
    %cst_5 = arith.constant 5.000000e-01 : f32
    %6 = vector.broadcast %cst_5 : f32 to vector<16x64xf32>
    %7 = arith.mulf %6, %5 : vector<16x64xf32>
    %cst_6 = arith.constant 0.707106769 : f32
    %8 = vector.broadcast %cst_6 : f32 to vector<16x64xf32>
    %9 = arith.mulf %5, %8 : vector<16x64xf32>
    %10 = math.erf %9 : vector<16x64xf32>
    %cst_7 = arith.constant 1.000000e+00 : f32
    %11 = vector.broadcast %cst_7 : f32 to vector<16x64xf32>
    %12 = arith.addf %11, %10 : vector<16x64xf32>
    %13 = arith.mulf %7, %12 : vector<16x64xf32>
    %c0_8 = arith.constant 0 : index
    %c0_9 = arith.constant 0 : index
    %14 = vector.load %arg4[%c0_8, %c0_9] : memref<64x48xf32, #tpu.memory_space<vmem>>, vector<64x48xf32>
    %cst_10 = arith.constant dense<0.000000e+00> : vector<16x48xf32>
    %15 = tpu.matmul %13, %14, %cst_10 {dimension_numbers = #tpu.dot_dimension_numbers<[1], [0], [0], [1], [0, 0, 1, 1], [], []>} : vector<16x64xf32>, vector<64x48xf32>, vector<16x48xf32> -> vector<16x48xf32>
    %c0_11 = arith.constant 0 : index
    %c0_12 = arith.constant 0 : index
    %16 = vector.load %arg5[%c0_11, %c0_12] : memref<1x48xf32, #tpu.memory_space<vmem>>, vector<1x48xf32>
    %17 = vector.broadcast %16 : vector<1x48xf32> to vector<16x48xf32>
    %18 = arith.addf %15, %17 : vector<16x48xf32>
    %cst_13 = arith.constant 5.000000e-01 : f32
    %19 = vector.broadcast %cst_13 : f32 to vector<16x48xf32>
    %20 = arith.mulf %19, %18 : vector<16x48xf32>
    %cst_14 = arith.constant 0.707106769 : f32
    %21 = vector.broadcast %cst_14 : f32 to vector<16x48xf32>
    %22 = arith.mulf %18, %21 : vector<16x48xf32>
    %23 = math.erf %22 : vector<16x48xf32>
    %cst_15 = arith.constant 1.000000e+00 : f32
    %24 = vector.broadcast %cst_15 : f32 to vector<16x48xf32>
    %25 = arith.addf %24, %23 : vector<16x48xf32>
    %26 = arith.mulf %20, %25 : vector<16x48xf32>
    %c0_16 = arith.constant 0 : index
    %c0_17 = arith.constant 0 : index
    %27 = vector.load %arg6[%c0_16, %c0_17] : memref<48x128xf32, #tpu.memory_space<vmem>>, vector<48x128xf32>
    %cst_18 = arith.constant dense<0.000000e+00> : vector<16x128xf32>
    %28 = tpu.matmul %26, %27, %cst_18 {dimension_numbers = #tpu.dot_dimension_numbers<[1], [0], [0], [1], [0, 0, 1, 1], [], []>} : vector<16x48xf32>, vector<48x128xf32>, vector<16x128xf32> -> vector<16x128xf32>
    %c0_19 = arith.constant 0 : index
    %c0_20 = arith.constant 0 : index
    %29 = vector.load %arg7[%c0_19, %c0_20] : memref<1x128xf32, #tpu.memory_space<vmem>>, vector<1x128xf32>
    %30 = vector.broadcast %29 : vector<1x128xf32> to vector<16x128xf32>
    %31 = arith.addf %28, %30 : vector<16x128xf32>
    %c0_21 = arith.constant 0 : index
    %c0_22 = arith.constant 0 : index
    %32 = vector.load %arg8[%c0_21, %c0_22] : memref<16x128xf32, #tpu.memory_space<vmem>>, vector<16x128xf32>
    tpu.vector_store %arg8[%c0_21, %c0_22], %31 {strides = array<i32>} : memref<16x128xf32, #tpu.memory_space<vmem>>, vector<16x128xf32>,
    return
  }
  func.func @transform_0(%arg0: i32) -> (i32, i32) {
    %c0_i32 = arith.constant 0 : i32
    %c0_i32_0 = arith.constant 0 : i32
    return %arg0, %c0_i32 : i32, i32
  }
  func.func @transform_1(%arg0: i32) -> (i32, i32) {
    %c0_i32 = arith.constant 0 : i32
    %c0_i32_0 = arith.constant 0 : i32
    %c0_i32_1 = arith.constant 0 : i32
    return %c0_i32, %c0_i32_0 : i32, i32
  }
  func.func @transform_2(%arg0: i32) -> (i32, i32) {
    %c0_i32 = arith.constant 0 : i32
    %c0_i32_0 = arith.constant 0 : i32
    %c0_i32_1 = arith.constant 0 : i32
    return %c0_i32, %c0_i32_0 : i32, i32
  }
  func.func @transform_3(%arg0: i32) -> (i32, i32) {
    %c0_i32 = arith.constant 0 : i32
    %c0_i32_0 = arith.constant 0 : i32
    %c0_i32_1 = arith.constant 0 : i32
    return %c0_i32, %c0_i32_0 : i32, i32
  }
  func.func @transform_4(%arg0: i32) -> (i32, i32) {
    %c0_i32 = arith.constant 0 : i32
    %c0_i32_0 = arith.constant 0 : i32
    %c0_i32_1 = arith.constant 0 : i32
    return %c0_i32, %c0_i32_0 : i32, i32
  }
  func.func @transform_5(%arg0: i32) -> (i32, i32) {
    %c0_i32 = arith.constant 0 : i32
    %c0_i32_0 = arith.constant 0 : i32
    %c0_i32_1 = arith.constant 0 : i32
    return %c0_i32, %c0_i32_0 : i32, i32
  }
  func.func @transform_6(%arg0: i32) -> (i32, i32) {
    %c0_i32 = arith.constant 0 : i32
    %c0_i32_0 = arith.constant 0 : i32
    %c0_i32_1 = arith.constant 0 : i32
    return %c0_i32, %c0_i32_0 : i32, i32
  }
  func.func @transform_7(%arg0: i32) -> (i32, i32) {
    %c0_i32 = arith.constant 0 : i32
    %c0_i32_0 = arith.constant 0 : i32
    return %arg0, %c0_i32 : i32, i32
  }
}

</mosaic_0001>

<bundles_post_ra>
// kernel: three_nonlinear_classifier.1
= control target key start
LH: loop header
LB: loop body
LE: loop exit
PB: predicated region body
PF: predicated region fallthrough
CT: control target
= control target key end

     0   :  { %vm39_vm0 = vcmask 261120   ;;  %vm146_vm1 = vcmask 523264   ;;  %vm251_vm2 = vcmask 392192   ;;  %s576_s1 = inlined_call_operand.vmem [shape: f32[32,64], index: 1, kind: input, shape index: {}]   ;;  %s577_s0 = inlined_call_operand.vmem [shape: f32[16,32], index: 0, kind: input, shape index: {}]   ;;  %s578_s3 = inlined_call_operand.vmem [shape: f32[64,48], index: 3, kind: input, shape index: {}]   ;;  %s579_s2 = inlined_call_operand.vmem [shape: f32[1,64], index: 2, kind: input, shape index: {}]   ;;  %s580_s5 = inlined_call_operand.vmem [shape: f32[48,128], index: 5, kind: input, shape index: {}]   ;;  %s581_s4 = inlined_call_operand.vmem [shape: f32[1,48], index: 4, kind: input, shape index: {}]   ;;  %s582_s6 = inlined_call_operand.vmem [shape: f32[1,128], index: 6, kind: input, shape index: {}]   ;;  %s583_s7 = inlined_call_operand.vmem [shape: f32[16,128], index: 7, kind: output, shape index: {}]  }
   0x1   :  { %v28_v0 = vld [vmem:[%s576_s1] sm:$0xff]  ;;  %v29_v1 = vld [vmem:[%s576_s1 + $0x8] sm:$0xff]  ;;  %v30_v2 = vld [vmem:[%s576_s1 + $0x10] sm:$0xff] }
   0x2   :  { %v417_v3 = vpack.c.bf16 %v29_v1, %v28_v0  ;;  %v31_v4 = vld [vmem:[%s576_s1 + $0x18] sm:$0xff]  ;;  %v26_v5 = vld [vmem:[%s577_s0] sm:$0xff]  ;;  %v27_v7 = vld [vmem:[%s577_s0 + $0x8] sm:$0xff] }
   0x3   :  { %v421_v6 = vpack.c.bf16 %v31_v4, %v30_v2  ;;  %380 = vmatprep.mubr.msk.f32.mxu0 %vm39_vm0, %v26_v5  ;;  %v131_v8 = vld [vmem:[%s578_s3] sm:$0xff]  ;;  %v132_v9 = vld [vmem:[%s578_s3 + $0x8] sm:$0xff]  ;;  %v133_v11 = vld [vmem:[%s578_s3 + $0x10] sm:$0xff] }
   0x4   :  { %418 = vmatprep.subr.bf16.mxu0 %v417_v3  ;;  %v425_v10 = vpack.c.bf16 %v132_v9, %v131_v8  ;;  %v134_v12 = vld [vmem:[%s578_s3 + $0x18] sm:$0xff]  ;;  %v135_v14 = vld [vmem:[%s578_s3 + $0x20] sm:$0xff]  ;;  %v136_v15 = vld [vmem:[%s578_s3 + $0x28] sm:$0xff] }
   0x5   :  { %420 = vmatpush3.bf16.msra.mxu0 %v417_v3  ;;  %v429_v13 = vpack.c.bf16 %v134_v12, %v133_v11  ;;  %v433_v16 = vpack.c.bf16 %v136_v15, %v135_v14  ;;  %v137_v17 = vld [vmem:[%s578_s3 + $0x30] sm:$0xff]  ;;  %v138_v18 = vld [vmem:[%s578_s3 + $0x38] sm:$0xff]  ;;  %v339_v20 = vld [vmem:[%s579_s2] ss:$0 sm:$0xff] }
   0x6   :  { %422 = vmatprep.subr.bf16.mxu0 %v421_v6  ;;  %426 = vmatprep.subr.bf16.mxu1 %v425_v10  ;;  %v437_v19 = vpack.c.bf16 %v138_v18, %v137_v17  ;;  %v238_v35 = vld [vmem:[%s580_s5] sm:$0xff]  ;;  %v239_v36 = vld [vmem:[%s580_s5 + $0x8] sm:$0xff]  ;;  %v240_v38 = vld [vmem:[%s580_s5 + $0x10] sm:$0xff] }
   0x7   :  { %428 = vmatpush3.bf16.msra.mxu1 %v425_v10  ;;  %v441_v37 = vpack.c.bf16 %v239_v36, %v238_v35  ;;  %v241_v39 = vld [vmem:[%s580_s5 + $0x18] sm:$0xff]  ;;  %v242_v41 = vld [vmem:[%s580_s5 + $0x20] sm:$0xff]  ;;  %v243_v42 = vld [vmem:[%s580_s5 + $0x28] sm:$0xff] }
   0x8   :  { %430 = vmatprep.subr.bf16.mxu1 %v429_v13  ;;  %v445_v40 = vpack.c.bf16 %v241_v39, %v240_v38  ;;  %v449_v43 = vpack.c.bf16 %v243_v42, %v242_v41  ;;  %v342_v44 = vld [vmem:[%s581_s4] ss:$0 sm:$0xff] }
   0x9   :  { %424 = vmatpush3.bf16.msra.mxu0 %v421_v6  ;;  %v345_v59 = vld [vmem:[%s582_s6] ss:$0 sm:$0xff] }
   0xa   :  { %442 = vmatprep.subr.bf16.mxu0 %v441_v37 }
   0xb   :  { %432 = vmatpush3.bf16.msra.mxu1 %v429_v13 }
   0xc   :  { %381 = vmatmul.mubr.msk.f32.vlgmr.msra.gmra.mrb[0].mxu0 %vm39_vm0, %v27_v7  ;;  %434 = vmatprep.subr.bf16.mxu1 %v433_v16 }
   0xd   :  { %444 = vmatpush3.bf16.msra.mxu0 %v441_v37 }
   0xe   :  { %446 = vmatprep.subr.bf16.mxu0 %v445_v40 }
   0xf   :  { %436 = vmatpush3.bf16.msra.mxu1 %v433_v16 }
  0x10   :  { %438 = vmatprep.subr.bf16.mxu1 %v437_v19 }
  0x11   :  { %448 = vmatpush3.bf16.msra.mxu0 %v445_v40 }
  0x12   :  { %450 = vmatprep.subr.bf16.mxu0 %v449_v43 }
  0x13   :  { %440 = vmatpush3.bf16.msra.mxu1 %v437_v19 }
  0x15   :  { %452 = vmatpush3.bf16.msra.mxu0 %v449_v43 }
  0xdf   :  { %v382_v21 = vpop.f32.mrb[0].mxu0 }
  0xe0   :  { %v118_v22 = vadd.f32 %v382_v21, %v339_v20  ;;  %v112_v23 = vpop.f32.mrb[1].mxu0 }
  0xe1   :  { %v113_v24 = vadd.f32 %v339_v20, %v112_v23 }
  0xe2   :  { %v124_v25 = vmul.f32 0.70710677, %v118_v22  ;;  %v122_v32 = vmul.f32 0.5, %v118_v22 }
  0xe3   :  { %v123_v26 = vmul.f32 0.70710677, %v113_v24  ;;  %v121_v30 = vmul.f32 0.5, %v113_v24 }
  0xe4   :  { %453 = verf.f32 %v124_v25 }
  0xe5   :  { %455 = verf.f32 %v123_v26 }
  0xee   :  { %v454_v27 = vpop.eup %453 }
  0xef   :  { %v456_v28 = vpop.eup %455  ;;  %v128_v29 = vadd.f32 1.0, %v454_v27 }
  0xf0   :  { %v127_v31 = vadd.f32 1.0, %v456_v28 }
  0xf1   :  { %v130_v34 = vmul.f32 %v128_v29, %v122_v32 }
  0xf2   :  { %v129_v33 = vmul.f32 %v127_v31, %v121_v30 }
  0xf4   :  { %399 = vmatprep.mubr.msk.f32.mxu1 %vm146_vm1, %v129_v33 }
  0xf5   :  { %400 = vmatmul.mubr.msk.f32.vlgmr.msra.gmra.mrb[0].mxu1 %vm146_vm1, %v130_v34 }
 0x1c8   :  { %v401_v45 = vpop.f32.mrb[0].mxu1 }
 0x1c9   :  { %v225_v46 = vadd.f32 %v401_v45, %v342_v44  ;;  %v219_v47 = vpop.f32.mrb[1].mxu1 }
 0x1ca   :  { %v220_v48 = vadd.f32 %v342_v44, %v219_v47 }
 0x1cb   :  { %v231_v49 = vmul.f32 0.70710677, %v225_v46  ;;  %v229_v56 = vmul.f32 0.5, %v225_v46 }
 0x1cc   :  { %v230_v50 = vmul.f32 0.70710677, %v220_v48  ;;  %v228_v54 = vmul.f32 0.5, %v220_v48 }
 0x1cd   :  { %457 = verf.f32 %v231_v49 }
 0x1ce   :  { %459 = verf.f32 %v230_v50 }
 0x1d7   :  { %v458_v51 = vpop.eup %457 }
 0x1d8   :  { %v460_v52 = vpop.eup %459  ;;  %v235_v53 = vadd.f32 1.0, %v458_v51 }
 0x1d9   :  { %v234_v55 = vadd.f32 1.0, %v460_v52 }
 0x1da   :  { %v237_v58 = vmul.f32 %v235_v53, %v229_v56 }
 0x1db   :  { %v236_v57 = vmul.f32 %v234_v55, %v228_v54 }
 0x1dd   :  { %414 = vmatprep.mubr.msk.f32.mxu0 %vm251_vm2, %v236_v57 }
 0x1de   :  { %415 = vmatmul.mubr.msk.f32.vlgmr.msra.gmra.mrb[2].mxu0 %vm251_vm2, %v237_v58 }
 0x2b1   :  { %v416_v60 = vpop.f32.mrb[2].mxu0 }
 0x2b2   :  { %v330_v61 = vadd.f32 %v416_v60, %v345_v59  ;;  %v324_v62 = vpop.f32.mrb[3].mxu0 }
 0x2b3   :  { %v325_v63 = vadd.f32 %v345_v59, %v324_v62 }
 0x2b4   :  { %334 = vst [vmem:[%s583_s7 + $0x8] sm:$0xff] %v330_v61 }
 0x2b5   :  { %333 = vst [vmem:[%s583_s7] sm:$0xff] %v325_v63 }

</bundles_post_ra>
